<compile_context>
chip_gen: v6e
topology: v6e:2x2x1
jax: 0.10.0
libtpu: 0.0.40
codegen_flags: <defaults>
</compile_context>

<pallas_src>
import functools

import jax
import jax.numpy as jnp
from jax.experimental import pallas as pl
from jax.experimental.pallas import tpu as pltpu

LANE = 128      # TPU lane width
SUBLANE = 8     # TPU sublane width


def _round_up(x, m):
    return ((x + m - 1) // m) * m


def mlp_kernel(x_ref, w1_ref, b1_ref, w2_ref, b2_ref, o_ref):
    # Cast f32 activations to bf16 on the VPU right before the MXU (x is
    # DMA'd exactly once, in f32; no HBM round-trip for the cast).
    x = x_ref[...].astype(w1_ref.dtype)
    # fc1: (tb, D_in) @ (D_in, H) -> f32 accumulator on the MXU.
    h = jnp.dot(x, w1_ref[...], preferred_element_type=jnp.float32)
    # Bias + ReLU in f32 on the VPU (safe on v5e which has no bf16 VPU path).
    h = jnp.maximum(h + b1_ref[...], 0.0)
    # fc2: (tb, H) @ (H, D_pad) — lane-dense padded output columns.
    out = jnp.dot(h.astype(w2_ref.dtype), w2_ref[...],
                  preferred_element_type=jnp.float32)
    # Bias add in f32, then store bf16 (halves the HBM writeback stream).
    o_ref[...] = (out + b2_ref[...]).astype(o_ref.dtype)


def prepare_policy_params(w1, b1, w2, b2, *, compute_dtype=jnp.bfloat16):
    """One-time 'init' step: cast / zero-pad the static parameters.

    w1: (D_in, H)   b1: (1, H)   w2: (H, D_out)   b2: (1, D_out)
    Weights are stored transposed vs. PyTorch nn.Linear so the kernel computes
    x @ W + b directly on the MXU.
    """
    d_out = w2.shape[1]
    d_pad = max(LANE, _round_up(d_out, LANE))
    w1c = w1.astype(compute_dtype)
    b1f = b1.astype(jnp.float32)
    w2p = jnp.pad(w2, ((0, 0), (0, d_pad - d_out))).astype(compute_dtype)
    b2p = jnp.pad(b2, ((0, 0), (0, d_pad - d_out))).astype(jnp.float32)
    return w1c, b1f, w2p, b2p, d_out


@functools.partial(jax.jit, static_argnames=("d_out", "block_b"))
def policy_network_forward(x, w1c, b1f, w2p, b2p, *, d_out, block_b=1024):
    """relu(x @ w1 + b1) @ w2 + b2, with params from prepare_policy_params."""
    B, D_in = x.shape
    H = w1c.shape[1]
    D_pad = w2p.shape[1]

    # Batch tiling: at most 7 rows of padding, and >= 2 tiles whenever the
    # batch allows so the "parallel" axis can feed both v7x TensorCores.
    B8 = _round_up(B, SUBLANE)
    num_tiles = max(1, pl.cdiv(B8, block_b))
    if B8 >= 2 * SUBLANE:
        num_tiles = max(num_tiles, 2)
    tile_b = _round_up(pl.cdiv(B8, num_tiles), SUBLANE)
    B_pad = tile_b * num_tiles

    xq = x if B_pad == B else jnp.pad(x, ((0, B_pad - B), (0, 0)))

    flops = 2 * B_pad * (D_in * H + H * D_pad)
    bytes_accessed = (
        B_pad * D_in * 4          # x (f32, read once by the kernel)
        + D_in * H * 2            # w1 (bf16)
        + H * 4                   # b1 (f32)
        + H * D_pad * 2           # w2 (bf16, padded)
        + D_pad * 4               # b2 (f32, padded)
        + B_pad * D_pad * 2       # output (bf16)
    )

    vmem = pltpu.MemorySpace.VMEM

    out_padded = pl.pallas_call(
        mlp_kernel,
        out_shape=jax.ShapeDtypeStruct((B_pad, D_pad), jnp.bfloat16),
        grid=(num_tiles,),
        in_specs=[
            # Batch-tiled f32 activations.
            pl.BlockSpec((tile_b, D_in), lambda i: (i, 0), memory_space=vmem),
            # Weights/biases: constant index_map -> VMEM-resident across tiles.
            pl.BlockSpec((D_in, H), lambda i: (0, 0), memory_space=vmem),
            pl.BlockSpec((1, H), lambda i: (0, 0), memory_space=vmem),
            pl.BlockSpec((H, D_pad), lambda i: (0, 0), memory_space=vmem),
            pl.BlockSpec((1, D_pad), lambda i: (0, 0), memory_space=vmem),
        ],
        out_specs=pl.BlockSpec((tile_b, D_pad), lambda i: (i, 0),
                               memory_space=vmem),
        compiler_params=pltpu.CompilerParams(
            dimension_semantics=("parallel",),  # megacore split over batch tiles
        ),
        cost_estimate=pl.CostEstimate(
            flops=flops, transcendentals=0, bytes_accessed=bytes_accessed),
    )(xq, w1c, b1f, w2p, b2p)

    # Strip batch/output padding; return f32 logits (tiny fused slice + cast).
    return out_padded[:B, :d_out].astype(jnp.float32)


if __name__ == "__main__":
    # Small-but-batched deterministic shapes consistent with the module
    # (real input_size is DialoGPT-medium's hidden dim 1024; shrunk here).
    batch = 512          # many rollout states per call -> amortizes launch cost
    input_size = 64
    hidden_size = 128
    output_size = 2

    key = jax.random.PRNGKey(0)
    k_x, k_w1, k_b1, k_w2, k_b2 = jax.random.split(key, 5)

    x = jax.random.normal(k_x, (batch, input_size), dtype=jnp.float32)

    # Deterministic init mimicking nn.Linear uniform(-1/sqrt(fan_in), +1/sqrt(fan_in)).
    bound1 = 1.0 / (input_size ** 0.5)
    w1 = jax.random.uniform(k_w1, (input_size, hidden_size), jnp.float32,
                            minval=-bound1, maxval=bound1)
    b1 = jax.random.uniform(k_b1, (1, hidden_size), jnp.float32,
                            minval=-bound1, maxval=bound1)

    bound2 = 1.0 / (hidden_size ** 0.5)
    w2 = jax.random.uniform(k_w2, (hidden_size, output_size), jnp.float32,
                            minval=-bound2, maxval=bound2)
    b2 = jax.random.uniform(k_b2, (1, output_size), jnp.float32,
                            minval=-bound2, maxval=bound2)

    # One-time parameter prep (cast + pad) — outside the per-call hot path.
    w1c, b1f, w2p, b2p, d_out = prepare_policy_params(w1, b1, w2, b2)

    out = policy_network_forward(x, w1c, b1f, w2p, b2p, d_out=d_out)
    out = jax.block_until_ready(out)
    assert out.shape == (batch, output_size)
    assert out.dtype == jnp.float32

    # Reference mimicking the kernel's bf16-input / f32-accumulate / bf16-store math.
    xb = x.astype(jnp.bfloat16)
    w1b = w1.astype(jnp.bfloat16)
    w2b = w2.astype(jnp.bfloat16)
    h_ref = jnp.maximum(
        jnp.dot(xb, w1b, preferred_element_type=jnp.float32) + b1, 0.0)
    ref = (jnp.dot(h_ref.astype(jnp.bfloat16), w2b,
                   preferred_element_type=jnp.float32) + b2)
    ref = ref.astype(jnp.bfloat16).astype(jnp.float32)
    assert jnp.allclose(out, ref, atol=1e-2, rtol=1e-2)

    # Loose sanity check against the pure-f32 PyTorch-equivalent forward.
    # NOTE: bf16 matmul inputs + bf16 output store lose precision vs. pure f32;
    # fine for a 2-way policy head, documented here for downstream softmax users.
    ref_f32 = jnp.maximum(x @ w1 + b1, 0.0) @ w2 + b2
    assert jnp.allclose(out, ref_f32, atol=8e-2, rtol=8e-2)

    print("KERNEL_OK")
</pallas_src>

<mosaic_0001>
module attributes {stable_mosaic.version = 11 : i64} {
  func.func @mlp_kernel(%arg0: i32, %arg1: memref<256x64xf32, #tpu.memory_space<vmem>>, %arg2: memref<64x128xbf16, #tpu.memory_space<vmem>>, %arg3: memref<1x128xf32, #tpu.memory_space<vmem>>, %arg4: memref<128x128xbf16, #tpu.memory_space<vmem>>, %arg5: memref<1x128xf32, #tpu.memory_space<vmem>>, %arg6: memref<256x128xbf16, #tpu.memory_space<vmem>>) attributes {dimension_semantics = [#tpu.dimension_semantics<parallel>], iteration_bounds = array<i64: 2>, scalar_prefetch = 0 : i64, scratch_operands = 0 : i64, tpu.core_type = #tpu.core_type<tc>, window_params = [{transform_indices = @transform_0, window_bounds = array<i64: 256, 64>}, {pipeline_mode = #tpu.pipeline_mode<synchronous>, transform_indices = @transform_1, window_bounds = array<i64: 64, 128>}, {pipeline_mode = #tpu.pipeline_mode<synchronous>, transform_indices = @transform_2, window_bounds = array<i64: 1, 128>}, {pipeline_mode = #tpu.pipeline_mode<synchronous>, transform_indices = @transform_3, window_bounds = array<i64: 128, 128>}, {pipeline_mode = #tpu.pipeline_mode<synchronous>, transform_indices = @transform_4, window_bounds = array<i64: 1, 128>}, {transform_indices = @transform_5, window_bounds = array<i64: 256, 128>}]} {
    %c0 = arith.constant 0 : index
    %c0_0 = arith.constant 0 : index
    %0 = vector.load %arg1[%c0, %c0_0] : memref<256x64xf32, #tpu.memory_space<vmem>>, vector<256x64xf32>
    %1 = arith.truncf %0 : vector<256x64xf32> to vector<256x64xbf16>
    %c0_1 = arith.constant 0 : index
    %c0_2 = arith.constant 0 : index
    %2 = vector.load %arg2[%c0_1, %c0_2] : memref<64x128xbf16, #tpu.memory_space<vmem>>, vector<64x128xbf16>
    %cst = arith.constant dense<0.000000e+00> : vector<256x128xf32>
    %3 = tpu.matmul %1, %2, %cst {dimension_numbers = #tpu.dot_dimension_numbers<[1], [0], [0], [1], [0, 0, 1, 1], [], []>} : vector<256x64xbf16>, vector<64x128xbf16>, vector<256x128xf32> -> vector<256x128xf32>
    %c0_3 = arith.constant 0 : index
    %c0_4 = arith.constant 0 : index
    %4 = vector.load %arg3[%c0_3, %c0_4] : memref<1x128xf32, #tpu.memory_space<vmem>>, vector<1x128xf32>
    %5 = vector.broadcast %4 : vector<1x128xf32> to vector<256x128xf32>
    %6 = arith.addf %3, %5 : vector<256x128xf32>
    %cst_5 = arith.constant 0.000000e+00 : f32
    %7 = vector.broadcast %cst_5 : f32 to vector<256x128xf32>
    %8 = arith.maximumf %6, %7 : vector<256x128xf32>
    %9 = arith.truncf %8 : vector<256x128xf32> to vector<256x128xbf16>
    %c0_6 = arith.constant 0 : index
    %c0_7 = arith.constant 0 : index
    %10 = vector.load %arg4[%c0_6, %c0_7] : memref<128x128xbf16, #tpu.memory_space<vmem>>, vector<128x128xbf16>
    %cst_8 = arith.constant dense<0.000000e+00> : vector<256x128xf32>
    %11 = tpu.matmul %9, %10, %cst_8 {dimension_numbers = #tpu.dot_dimension_numbers<[1], [0], [0], [1], [0, 0, 1, 1], [], []>} : vector<256x128xbf16>, vector<128x128xbf16>, vector<256x128xf32> -> vector<256x128xf32>
    %c0_9 = arith.constant 0 : index
    %c0_10 = arith.constant 0 : index
    %12 = vector.load %arg5[%c0_9, %c0_10] : memref<1x128xf32, #tpu.memory_space<vmem>>, vector<1x128xf32>
    %13 = vector.broadcast %12 : vector<1x128xf32> to vector<256x128xf32>
    %14 = arith.addf %11, %13 : vector<256x128xf32>
    %15 = arith.truncf %14 : vector<256x128xf32> to vector<256x128xbf16>
    %c0_11 = arith.constant 0 : index
    %c0_12 = arith.constant 0 : index
    %16 = vector.load %arg6[%c0_11, %c0_12] : memref<256x128xbf16, #tpu.memory_space<vmem>>, vector<256x128xbf16>
    tpu.vector_store %arg6[%c0_11, %c0_12], %15 {strides = array<i32>} : memref<256x128xbf16, #tpu.memory_space<vmem>>, vector<256x128xbf16>,
    return
  }
  func.func @transform_0(%arg0: i32) -> (i32, i32) {
    %c0_i32 = arith.constant 0 : i32
    %c0_i32_0 = arith.constant 0 : i32
    return %arg0, %c0_i32 : i32, i32
  }
  func.func @transform_1(%arg0: i32) -> (i32, i32) {
    %c0_i32 = arith.constant 0 : i32
    %c0_i32_0 = arith.constant 0 : i32
    %c0_i32_1 = arith.constant 0 : i32
    return %c0_i32, %c0_i32_0 : i32, i32
  }
  func.func @transform_2(%arg0: i32) -> (i32, i32) {
    %c0_i32 = arith.constant 0 : i32
    %c0_i32_0 = arith.constant 0 : i32
    %c0_i32_1 = arith.constant 0 : i32
    return %c0_i32, %c0_i32_0 : i32, i32
  }
  func.func @transform_3(%arg0: i32) -> (i32, i32) {
    %c0_i32 = arith.constant 0 : i32
    %c0_i32_0 = arith.constant 0 : i32
    %c0_i32_1 = arith.constant 0 : i32
    return %c0_i32, %c0_i32_0 : i32, i32
  }
  func.func @transform_4(%arg0: i32) -> (i32, i32) {
    %c0_i32 = arith.constant 0 : i32
    %c0_i32_0 = arith.constant 0 : i32
    %c0_i32_1 = arith.constant 0 : i32
    return %c0_i32, %c0_i32_0 : i32, i32
  }
  func.func @transform_5(%arg0: i32) -> (i32, i32) {
    %c0_i32 = arith.constant 0 : i32
    %c0_i32_0 = arith.constant 0 : i32
    return %arg0, %c0_i32 : i32, i32
  }
}

</mosaic_0001>

<bundles_post_ra>
// kernel: policy_network_forward.1
= control target key start
LH: loop header
LB: loop body
LE: loop exit
PB: predicated region body
PF: predicated region fallthrough
CT: control target
= control target key end

     0   :  { %s1428_s18 = smov 0   ;;  %s1627_s0 = inlined_call_operand.vmem [shape: f32[512,64], index: 0, kind: input, shape index: {}]   ;;  %s1628_s1 = inlined_call_operand.vmem [shape: bf16[64,128], index: 1, kind: input, shape index: {}]   ;;  %s1629_s2 = inlined_call_operand.vmem [shape: f32[1,128], index: 2, kind: input, shape index: {}]   ;;  %s1630_s3 = inlined_call_operand.vmem [shape: bf16[128,128], index: 3, kind: input, shape index: {}]   ;;  %s1631_s4 = inlined_call_operand.vmem [shape: f32[1,128], index: 4, kind: input, shape index: {}]   ;;  %s1632_s5 = inlined_call_operand.vmem [shape: bf16[512,128], index: 5, kind: output, shape index: {}]  }
   0x1 LB: > { %s1022_s19 = sadd.s32 4294967295, %s1396_s18   ;;  %p1026_p0 = scmp.ge.s32.totalorder %s1396_s18, 1  ;;  %s1396_s18 = sphi %s1428_s18, %s15_s18  }
   0x2   : > { %p188_p1 = scmp.lt.s32.totalorder %s1396_s18, 3 }
   0x4   : > { %p189_p2 = pnand %p1026_p0, %p188_p1 }
   0x5   : > { %s1027_s22 = sshll.u32 (!%p189_p2), %s1022_s19, 5 }
   0x6   : > { %192 = sbr.rel (%p189_p2) target bundleno = 494 (0x1ee), region = 40  ;;  %p217_p3 = scmp.lt.s32.totalorder (!%p189_p2), %s1027_s22, 63 }
   0xb   : > { %v1378_v0 = vld [vmem:[%s1628_s1 + $0x18] sm:$0xff]   ;;  %v1379_v1 = vld [vmem:[%s1628_s1 + $0x10] sm:$0xff]   ;;  %v1380_v2 = vld [vmem:[%s1628_s1 + $0x8] sm:$0xff]   ;;  %s1634_s22 = smov (!%p217_p3, %s1027_s22), 63  ;;  %vm316_vm0 = vcmask 523264  }
   0xc   : > { %1266 = vmatprep.subr.bf16.mxu0 %v1378_v0  ;;  %v1382_v3 = vld [vmem:[%s1630_s3 + $0x38] sm:$0xff]   ;;  %s1028_s29 = sshll.u32 %s1634_s22, 3  ;;  %v1383_v4 = vld [vmem:[%s1630_s3 + $0x30] sm:$0xff]   ;;  %v1381_v7 = vld [vmem:[%s1628_s1] sm:$0xff]   ;;  %s1030_s30 = sshll.u32 %s1634_s22, 2 }
   0xd   : > { %1267 = vmatpush3.bf16.msra.mxu0 %v1378_v0  ;;  %s1454_s7 = scalar_lea.vmem %s1627_s0, %s1028_s29  ;;  %1354 = vmatprep.subr.bf16.mxu1 %v1382_v3  ;;  %v1384_v9 = vld [vmem:[%s1630_s3 + $0x28] sm:$0xff]   ;;  %v1385_v20 = vld [vmem:[%s1630_s3 + $0x20] sm:$0xff]   ;;  %v1386_v21 = vld [vmem:[%s1630_s3 + $0x18] sm:$0xff]   ;;  %s1576_s8 = scalar_lea.vmem %s1632_s5, %s1030_s30 }
   0xe   : > { %1268 = vmatprep.subr.bf16.mxu0 %v1379_v1  ;;  %v229_v5 = vld [vmem:[%s1454_s7] sm:$0xff]  ;;  %v230_v6 = vld [vmem:[%s1454_s7 + $0x8] sm:$0xff]  ;;  %1362 = vmatpush3.bf16.msra.mxu1 %v1382_v3  ;;  %v231_v10 = vld [vmem:[%s1454_s7 + $0x10] sm:$0xff] }
   0xf   : > { %v261_v8 = vpack.c.bf16 %v230_v6, %v229_v5  ;;  %1355 = vmatprep.subr.bf16.mxu1 %v1383_v4  ;;  %v232_v11 = vld [vmem:[%s1454_s7 + $0x18] sm:$0xff]  ;;  %v233_v12 = vld [vmem:[%s1454_s7 + $0x20] sm:$0xff]  ;;  %v234_v13 = vld [vmem:[%s1454_s7 + $0x28] sm:$0xff] }
  0x10   : > { %v262_v14 = vpack.c.bf16 %v232_v11, %v231_v10  ;;  %v263_v15 = vpack.c.bf16 %v234_v13, %v233_v12  ;;  %v235_v16 = vld [vmem:[%s1454_s7 + $0x30] sm:$0xff]  ;;  %v236_v17 = vld [vmem:[%s1454_s7 + $0x38] sm:$0xff]  ;;  %v237_v18 = vld [vmem:[%s1454_s7 + $0x40] sm:$0xff] }
  0x11   : > { %1269 = vmatpush3.bf16.msra.mxu0 %v1379_v1  ;;  %1274 = vmatprep.mubr.msk.bf16.mxu0 %vm316_vm0, %v261_v8  ;;  %v238_v19 = vld [vmem:[%s1454_s7 + $0x48] sm:$0xff]  ;;  %v264_v22 = vpack.c.bf16 %v236_v17, %v235_v16  ;;  %v239_v24 = vld [vmem:[%s1454_s7 + $0x50] sm:$0xff]  ;;  %v240_v25 = vld [vmem:[%s1454_s7 + $0x58] sm:$0xff] }
  0x12   : > { %1270 = vmatprep.subr.bf16.mxu0 %v1380_v2  ;;  %1363 = vmatpush3.bf16.msra.mxu1 %v1383_v4  ;;  %v265_v23 = vpack.c.bf16 %v238_v19, %v237_v18  ;;  %v241_v26 = vld [vmem:[%s1454_s7 + $0x60] sm:$0xff]  ;;  %v242_v27 = vld [vmem:[%s1454_s7 + $0x68] sm:$0xff]  ;;  %v266_v28 = vpack.c.bf16 %v240_v25, %v239_v24  ;;  %v243_v30 = vld [vmem:[%s1454_s7 + $0x70] sm:$0xff] }
  0x13   : > { %1356 = vmatprep.subr.bf16.mxu1 %v1384_v9  ;;  %v267_v29 = vpack.c.bf16 %v242_v27, %v241_v26  ;;  %v244_v31 = vld [vmem:[%s1454_s7 + $0x78] sm:$0xff]  ;;  %v245_v32 = vld [vmem:[%s1454_s7 + $0x80] sm:$0xff]  ;;  %v246_v33 = vld [vmem:[%s1454_s7 + $0x88] sm:$0xff] }
  0x14   : > { %v268_v34 = vpack.c.bf16 %v244_v31, %v243_v30  ;;  %v269_v35 = vpack.c.bf16 %v246_v33, %v245_v32  ;;  %v247_v36 = vld [vmem:[%s1454_s7 + $0x90] sm:$0xff]  ;;  %v248_v37 = vld [vmem:[%s1454_s7 + $0x98] sm:$0xff]  ;;  %v249_v38 = vld [vmem:[%s1454_s7 + $0xa0] sm:$0xff] }
  0x15   : > { %1271 = vmatpush3.bf16.msra.mxu0 %v1380_v2  ;;  %v250_v39 = vld [vmem:[%s1454_s7 + $0xa8] sm:$0xff]  ;;  %v270_v40 = vpack.c.bf16 %v248_v37, %v247_v36  ;;  %v251_v42 = vld [vmem:[%s1454_s7 + $0xb0] sm:$0xff]  ;;  %v252_v43 = vld [vmem:[%s1454_s7 + $0xb8] sm:$0xff] }
  0x16   : > { %1272 = vmatprep.subr.bf16.mxu0 %v1381_v7  ;;  %1364 = vmatpush3.bf16.msra.mxu1 %v1384_v9  ;;  %v271_v41 = vpack.c.bf16 %v250_v39, %v249_v38  ;;  %v253_v44 = vld [vmem:[%s1454_s7 + $0xc0] sm:$0xff]  ;;  %v254_v45 = vld [vmem:[%s1454_s7 + $0xc8] sm:$0xff]  ;;  %v272_v46 = vpack.c.bf16 %v252_v43, %v251_v42  ;;  %v255_v48 = vld [vmem:[%s1454_s7 + $0xd0] sm:$0xff] }
  0x17   : > { %1357 = vmatprep.subr.bf16.mxu1 %v1385_v20  ;;  %v273_v47 = vpack.c.bf16 %v254_v45, %v253_v44  ;;  %v256_v49 = vld [vmem:[%s1454_s7 + $0xd8] sm:$0xff]  ;;  %v257_v50 = vld [vmem:[%s1454_s7 + $0xe0] sm:$0xff]  ;;  %v258_v51 = vld [vmem:[%s1454_s7 + $0xe8] sm:$0xff] }
  0x18   : > { %v274_v52 = vpack.c.bf16 %v256_v49, %v255_v48  ;;  %v275_v53 = vpack.c.bf16 %v258_v51, %v257_v50  ;;  %v259_v54 = vld [vmem:[%s1454_s7 + $0xf0] sm:$0xff]  ;;  %v260_v55 = vld [vmem:[%s1454_s7 + $0xf8] sm:$0xff]  ;;  %v1388_v58 = vld [vmem:[%s1630_s3 + $0x8] sm:$0xff]  }
  0x19   : > { %1273 = vmatpush3.bf16.msra.mxu0 %v1381_v7  ;;  %v276_v56 = vpack.c.bf16 %v260_v55, %v259_v54  ;;  %v1387_v57 = vld [vmem:[%s1630_s3 + $0x10] sm:$0xff]   ;;  %v1389_v59 = vld [vmem:[%s1630_s3] sm:$0xff]  }
  0x1a   : > { %1306 = vmatprep.subr.bf16.mxu0 %v1382_v3  ;;  %1365 = vmatpush3.bf16.msra.mxu1 %v1385_v20  ;;  %v1531_v62 = vld [vmem:[%s1629_s2] ss:$0 sm:$0xff] }
  0x1b   : > { %1358 = vmatprep.subr.bf16.mxu1 %v1386_v21 }
  0x1c   : > { %1275 = vmatmul.mubr.msk.bf16.vlgmr.msra.gmra.mxu0 %vm316_vm0, %v262_v14 }
  0x1d   : > { %1278 = vmatprep.mubr.msk.bf16.mxu0 %vm316_vm0, %v263_v15  ;;  %1307 = vmatpush3.bf16.msra.mxu0 %v1382_v3 }
  0x1e   : > { %1308 = vmatprep.subr.bf16.mxu0 %v1383_v4  ;;  %1366 = vmatpush3.bf16.msra.mxu1 %v1386_v21 }
  0x1f   : > { %1359 = vmatprep.subr.bf16.mxu1 %v1387_v57 }
  0x21   : > { %1309 = vmatpush3.bf16.msra.mxu0 %v1383_v4 }
  0x22   : > { %1310 = vmatprep.subr.bf16.mxu0 %v1384_v9  ;;  %1367 = vmatpush3.bf16.msra.mxu1 %v1387_v57 }
  0x23   : > { %1360 = vmatprep.subr.bf16.mxu1 %v1388_v58 }
  0x24   : > { %1279 = vmatmul.mubr.msk.bf16.gmra.mxu0 %vm316_vm0, %v264_v22 }
  0x25   : > { %1282 = vmatprep.mubr.msk.bf16.mxu0 %vm316_vm0, %v265_v23  ;;  %1311 = vmatpush3.bf16.msra.mxu0 %v1384_v9 }
  0x26   : > { %1312 = vmatprep.subr.bf16.mxu0 %v1385_v20  ;;  %1368 = vmatpush3.bf16.msra.mxu1 %v1388_v58 }
  0x27   : > { %1361 = vmatprep.subr.bf16.mxu1 %v1389_v59 }
  0x29   : > { %1313 = vmatpush3.bf16.msra.mxu0 %v1385_v20 }
  0x2a   : > { %1314 = vmatprep.subr.bf16.mxu0 %v1386_v21  ;;  %1369 = vmatpush3.bf16.msra.mxu1 %v1389_v59 }
  0x2c   : > { %1283 = vmatmul.mubr.msk.bf16.gmra.mxu0 %vm316_vm0, %v266_v28 }
  0x2d   : > { %1286 = vmatprep.mubr.msk.bf16.mxu0 %vm316_vm0, %v267_v29  ;;  %1315 = vmatpush3.bf16.msra.mxu0 %v1386_v21 }
  0x2e   : > { %1316 = vmatprep.subr.bf16.mxu0 %v1387_v57 }
  0x31   : > { %1317 = vmatpush3.bf16.msra.mxu0 %v1387_v57 }
  0x32   : > { %1318 = vmatprep.subr.bf16.mxu0 %v1388_v58 }
  0x34   : > { %1287 = vmatmul.mubr.msk.bf16.gmra.mxu0 %vm316_vm0, %v268_v34 }
  0x35   : > { %1290 = vmatprep.mubr.msk.bf16.mxu0 %vm316_vm0, %v269_v35  ;;  %1319 = vmatpush3.bf16.msra.mxu0 %v1388_v58 }
  0x36   : > { %1320 = vmatprep.subr.bf16.mxu0 %v1389_v59 }
  0x39   : > { %1321 = vmatpush3.bf16.msra.mxu0 %v1389_v59 }
  0x3c   : > { %1291 = vmatmul.mubr.msk.bf16.gmra.mxu0 %vm316_vm0, %v270_v40 }
  0x3d   : > { %1294 = vmatprep.mubr.msk.bf16.mxu0 %vm316_vm0, %v271_v41 }
  0x44   : > { %1295 = vmatmul.mubr.msk.bf16.gmra.mxu0 %vm316_vm0, %v272_v46 }
  0x45   : > { %1298 = vmatprep.mubr.msk.bf16.mxu0 %vm316_vm0, %v273_v47 }
  0x4c   : > { %1299 = vmatmul.mubr.msk.bf16.gmra.mxu0 %vm316_vm0, %v274_v52 }
  0x4d   : > { %1302 = vmatprep.mubr.msk.bf16.mxu0 %vm316_vm0, %v275_v53 }
  0x54   : > { %1303 = vmatmul.mubr.msk.bf16.gmra.mxu0 %vm316_vm0, %v276_v56 }
  0xdc   : > { %v1276_v60 = vpop.f32.mrf.mxu0 }
  0xdd   : > { %v408_v2 = vadd.f32 %v1276_v60, %v1531_v62 }
  0xde   : > { %v399_v61 = vpop.f32.mrf.mxu0 }
  0xdf   : > { %v400_v0 = vadd.f32 %v1531_v62, %v399_v61  ;;  %v528_v9 = vmax.f32 %v408_v2, 0.0 }
  0xe0   : > { %v1277_v63 = vpop.f32.mrf.mxu0 }
  0xe1   : > { %v411_v1 = vadd.f32 %v1277_v63, %v1531_v62  ;;  %v526_v7 = vmax.f32 %v400_v0, 0.0 }
  0xe2   : > { %v402_v3 = vpop.f32.mrf.mxu0 }
  0xe3   : > { %v403_v4 = vadd.f32 %v1531_v62, %v402_v3  ;;  %v529_v5 = vmax.f32 %v411_v1, 0.0 }
  0xe4   : > { %v1280_v6 = vpop.f32.mrf.mxu0 }
  0xe5   : > { %v527_v8 = vmax.f32 %v403_v4, 0.0  ;;  %v559_v12 = vpack.c.bf16 %v529_v5, %v528_v9  ;;  %v424_v16 = vadd.f32 %v1280_v6, %v1531_v62 }
  0xe6   : > { %v415_v10 = vpop.f32.mrf.mxu0 }
  0xe7   : > { %v558_v11 = vpack.c.bf16 %v527_v8, %v526_v7  ;;  %v416_v14 = vadd.f32 %v1531_v62, %v415_v10  ;;  %v532_v23 = vmax.f32 %v424_v16, 0.0 }
  0xe8   : > { %v1281_v13 = vpop.f32.mrf.mxu0 }
  0xe9   : > { %v427_v15 = vadd.f32 %v1281_v13, %v1531_v62  ;;  %1322 = vmatprep.mubr.bf16.mxu0 %v558_v11  ;;  %v530_v21 = vmax.f32 %v416_v14, 0.0 }
  0xea   : > { %v418_v17 = vpop.f32.mrf.mxu0  ;;  %1323 = vmatmul.mubr.bf16.vlgmr.msra.gmra.mxu0 %v559_v12 }
  0xeb   : > { %v419_v18 = vadd.f32 %v1531_v62, %v418_v17  ;;  %v533_v19 = vmax.f32 %v427_v15, 0.0 }
  0xec   : > { %v1284_v20 = vpop.f32.mrf.mxu0 }
  0xed   : > { %v531_v22 = vmax.f32 %v419_v18, 0.0  ;;  %v561_v26 = vpack.c.bf16 %v533_v19, %v532_v23  ;;  %v440_v30 = vadd.f32 %v1284_v20, %v1531_v62 }
  0xee   : > { %v431_v24 = vpop.f32.mrf.mxu0 }
  0xef   : > { %v560_v25 = vpack.c.bf16 %v531_v22, %v530_v21  ;;  %v432_v28 = vadd.f32 %v1531_v62, %v431_v24  ;;  %v536_v37 = vmax.f32 %v440_v30, 0.0 }
  0xf0   : > { %v1285_v27 = vpop.f32.mrf.mxu0 }
  0xf1   : > { %v443_v29 = vadd.f32 %v1285_v27, %v1531_v62  ;;  %1326 = vmatprep.mubr.bf16.mxu1 %v560_v25  ;;  %v534_v35 = vmax.f32 %v432_v28, 0.0 }
  0xf2   : > { %v434_v31 = vpop.f32.mrf.mxu0  ;;  %1327 = vmatmul.mubr.bf16.vlgmr.msra.gmra.mxu1 %v561_v26 }
  0xf3   : > { %v435_v32 = vadd.f32 %v1531_v62, %v434_v31  ;;  %v537_v33 = vmax.f32 %v443_v29, 0.0 }
  0xf4   : > { %v1288_v34 = vpop.f32.mrf.mxu0 }
  0xf5   : > { %v535_v36 = vmax.f32 %v435_v32, 0.0  ;;  %v563_v40 = vpack.c.bf16 %v537_v33, %v536_v37  ;;  %v456_v44 = vadd.f32 %v1288_v34, %v1531_v62 }
  0xf6   : > { %v447_v38 = vpop.f32.mrf.mxu0 }
  0xf7   : > { %v562_v39 = vpack.c.bf16 %v535_v36, %v534_v35  ;;  %v448_v42 = vadd.f32 %v1531_v62, %v447_v38  ;;  %v540_v51 = vmax.f32 %v456_v44, 0.0 }
  0xf8   : > { %v1289_v41 = vpop.f32.mrf.mxu0 }
  0xf9   : > { %v459_v43 = vadd.f32 %v1289_v41, %v1531_v62  ;;  %1330 = vmatprep.mubr.bf16.mxu1 %v562_v39  ;;  %v538_v49 = vmax.f32 %v448_v42, 0.0 }
  0xfa   : > { %v450_v45 = vpop.f32.mrf.mxu0  ;;  %1331 = vmatmul.mubr.bf16.gmra.mxu1 %v563_v40 }
  0xfb   : > { %v451_v46 = vadd.f32 %v1531_v62, %v450_v45  ;;  %v541_v47 = vmax.f32 %v459_v43, 0.0 }
  0xfc   : > { %v1292_v48 = vpop.f32.mrf.mxu0 }
  0xfd   : > { %v539_v50 = vmax.f32 %v451_v46, 0.0  ;;  %v565_v54 = vpack.c.bf16 %v541_v47, %v540_v51  ;;  %v472_v58 = vadd.f32 %v1292_v48, %v1531_v62  ;;  %v1568_v47 = vld [vmem:[%s1631_s4] ss:$0 sm:$0xff] }
  0xfe   : > { %v463_v52 = vpop.f32.mrf.mxu0 }
  0xff   : > { %v564_v53 = vpack.c.bf16 %v539_v50, %v538_v49  ;;  %v464_v56 = vadd.f32 %v1531_v62, %v463_v52  ;;  %v544_v2 = vmax.f32 %v472_v58, 0.0 }
 0x100   : > { %v1293_v55 = vpop.f32.mrf.mxu0 }
 0x101   : > { %v475_v57 = vadd.f32 %v1293_v55, %v1531_v62  ;;  %1334 = vmatprep.mubr.bf16.mxu1 %v564_v53  ;;  %v542_v0 = vmax.f32 %v464_v56, 0.0 }
 0x102   : > { %v466_v59 = vpop.f32.mrf.mxu0  ;;  %1335 = vmatmul.mubr.bf16.gmra.mxu1 %v565_v54 }
 0x103   : > { %v467_v60 = vadd.f32 %v1531_v62, %v466_v59  ;;  %v545_v61 = vmax.f32 %v475_v57, 0.0 }
 0x104   : > { %v1296_v63 = vpop.f32.mrf.mxu0 }
 0x105   : > { %v543_v1 = vmax.f32 %v467_v60, 0.0  ;;  %v567_v5 = vpack.c.bf16 %v545_v61, %v544_v2  ;;  %v488_v9 = vadd.f32 %v1296_v63, %v1531_v62 }
 0x106   : > { %v479_v3 = vpop.f32.mrf.mxu0 }
 0x107   : > { %v566_v4 = vpack.c.bf16 %v543_v1, %v542_v0  ;;  %v480_v7 = vadd.f32 %v1531_v62, %v479_v3  ;;  %v548_v16 = vmax.f32 %v488_v9, 0.0 }
 0x108   : > { %v1297_v6 = vpop.f32.mrf.mxu0 }
 0x109   : > { %v491_v8 = vadd.f32 %v1297_v6, %v1531_v62  ;;  %1338 = vmatprep.mubr.bf16.mxu1 %v566_v4  ;;  %v546_v14 = vmax.f32 %v480_v7, 0.0 }
 0x10a   : > { %v482_v10 = vpop.f32.mrf.mxu0  ;;  %1339 = vmatmul.mubr.bf16.gmra.mxu1 %v567_v5 }
 0x10b   : > { %v483_v11 = vadd.f32 %v1531_v62, %v482_v10  ;;  %v549_v12 = vmax.f32 %v491_v8, 0.0 }
 0x10c   : > { %v1300_v13 = vpop.f32.mrf.mxu0 }
 0x10d   : > { %v547_v15 = vmax.f32 %v483_v11, 0.0  ;;  %v569_v19 = vpack.c.bf16 %v549_v12, %v548_v16  ;;  %v504_v23 = vadd.f32 %v1300_v13, %v1531_v62 }
 0x10e   : > { %v495_v17 = vpop.f32.mrf.mxu0 }
 0x10f   : > { %v568_v18 = vpack.c.bf16 %v547_v15, %v546_v14  ;;  %v496_v21 = vadd.f32 %v1531_v62, %v495_v17  ;;  %v552_v30 = vmax.f32 %v504_v23, 0.0 }
 0x110   : > { %v1301_v20 = vpop.f32.mrf.mxu0 }
 0x111   : > { %v507_v22 = vadd.f32 %v1301_v20, %v1531_v62  ;;  %1342 = vmatprep.mubr.bf16.mxu1 %v568_v18  ;;  %v550_v28 = vmax.f32 %v496_v21, 0.0 }
 0x112   : > { %v498_v24 = vpop.f32.mrf.mxu0  ;;  %1343 = vmatmul.mubr.bf16.gmra.mxu1 %v569_v19 }
 0x113   : > { %v499_v25 = vadd.f32 %v1531_v62, %v498_v24  ;;  %v553_v26 = vmax.f32 %v507_v22, 0.0 }
 0x114   : > { %v1304_v27 = vpop.f32.mrf.mxu0 }
 0x115   : > { %v551_v29 = vmax.f32 %v499_v25, 0.0  ;;  %v571_v33 = vpack.c.bf16 %v553_v26, %v552_v30  ;;  %v520_v37 = vadd.f32 %v1304_v27, %v1531_v62 }
 0x116   : > { %v511_v31 = vpop.f32.mrf.mxu0 }
 0x117   : > { %v570_v32 = vpack.c.bf16 %v551_v29, %v550_v28  ;;  %v512_v35 = vadd.f32 %v1531_v62, %v511_v31  ;;  %v556_v43 = vmax.f32 %v520_v37, 0.0 }
 0x118   : > { %v1305_v34 = vpop.f32.mrf.mxu0 }
 0x119   : > { %v523_v36 = vadd.f32 %v1305_v34, %v1531_v62  ;;  %1346 = vmatprep.mubr.bf16.mxu1 %v570_v32  ;;  %v554_v41 = vmax.f32 %v512_v35, 0.0 }
 0x11a   : > { %v514_v38 = vpop.f32.mrf.mxu0  ;;  %1347 = vmatmul.mubr.bf16.gmra.mxu1 %v571_v33 }
 0x11b   : > { %v515_v39 = vadd.f32 %v1531_v62, %v514_v38  ;;  %v557_v40 = vmax.f32 %v523_v36, 0.0 }
 0x11d   : > { %v555_v42 = vmax.f32 %v515_v39, 0.0  ;;  %v573_v45 = vpack.c.bf16 %v557_v40, %v556_v43 }
 0x11f   : > { %v572_v44 = vpack.c.bf16 %v555_v42, %v554_v41 }
 0x121   : > { %1350 = vmatprep.mubr.bf16.mxu1 %v572_v44 }
 0x122   : > { %1351 = vmatmul.mubr.bf16.gmra.mxu1 %v573_v45 }
 0x1aa   : > { %v1324_v46 = vpop.f32.mrf.mxu0 }
 0x1ab   : > { %v688_v50 = vadd.f32 %v1324_v46, %v1568_v47 }
 0x1ac   : > { %v679_v48 = vpop.f32.mrf.mxu0 }
 0x1ad   : > { %v680_v52 = vadd.f32 %v1568_v47, %v679_v48 }
 0x1ae   : > { %v1325_v49 = vpop.f32.mrf.mxu0 }
 0x1af   : > { %v691_v62 = vadd.f32 %v1325_v49, %v1568_v47 }
 0x1b0   : > { %v682_v51 = vpop.f32.mrf.mxu0 }
 0x1b1   : > { %v1135_v53 = vpack.c.bf16 %v691_v62, %v688_v50  ;;  %v683_v54 = vadd.f32 %v1568_v47, %v682_v51 }
 0x1b2   : > { %v1328_v55 = vpop.f32.mrf.mxu1 }
 0x1b3   : > { %1207 = vst [vmem:[%s1576_s8 + $0x8] sm:$0xff] %v1135_v53   ;;  %v1130_v56 = vpack.c.bf16 %v683_v54, %v680_v52  ;;  %v704_v59 = vadd.f32 %v1328_v55, %v1568_v47 }
 0x1b4   : > { %v695_v57 = vpop.f32.mrf.mxu1 }
 0x1b5   : > { %1131 = vst [vmem:[%s1576_s8] sm:$0xff] %v1130_v56   ;;  %v696_v63 = vadd.f32 %v1568_v47, %v695_v57 }
 0x1b6   : > { %v1329_v58 = vpop.f32.mrf.mxu1 }
 0x1b7   : > { %v707_v60 = vadd.f32 %v1329_v58, %v1568_v47 }
 0x1b8   : > { %v698_v61 = vpop.f32.mrf.mxu1 }
 0x1b9   : > { %v1145_v0 = vpack.c.bf16 %v707_v60, %v704_v59  ;;  %v699_v1 = vadd.f32 %v1568_v47, %v698_v61 }
 0x1ba   : > { %v1332_v2 = vpop.f32.mrf.mxu1 }
 0x1bb   : > { %1209 = vst [vmem:[%s1576_s8 + $0x18] sm:$0xff] %v1145_v0   ;;  %v1140_v3 = vpack.c.bf16 %v699_v1, %v696_v63  ;;  %v720_v6 = vadd.f32 %v1332_v2, %v1568_v47 }
 0x1bc   : > { %v711_v4 = vpop.f32.mrf.mxu1 }
 0x1bd   : > { %1208 = vst [vmem:[%s1576_s8 + $0x10] sm:$0xff] %v1140_v3   ;;  %v712_v9 = vadd.f32 %v1568_v47, %v711_v4 }
 0x1be   : > { %v1333_v5 = vpop.f32.mrf.mxu1 }
 0x1bf   : > { %v723_v7 = vadd.f32 %v1333_v5, %v1568_v47 }
 0x1c0   : > { %v714_v8 = vpop.f32.mrf.mxu1 }
 0x1c1   : > { %v1155_v10 = vpack.c.bf16 %v723_v7, %v720_v6  ;;  %v715_v11 = vadd.f32 %v1568_v47, %v714_v8 }
 0x1c2   : > { %v1336_v12 = vpop.f32.mrf.mxu1 }
 0x1c3   : > { %1211 = vst [vmem:[%s1576_s8 + $0x28] sm:$0xff] %v1155_v10   ;;  %v1150_v13 = vpack.c.bf16 %v715_v11, %v712_v9  ;;  %v736_v16 = vadd.f32 %v1336_v12, %v1568_v47 }
 0x1c4   : > { %v727_v14 = vpop.f32.mrf.mxu1 }
 0x1c5   : > { %1210 = vst [vmem:[%s1576_s8 + $0x20] sm:$0xff] %v1150_v13   ;;  %v728_v19 = vadd.f32 %v1568_v47, %v727_v14 }
 0x1c6   : > { %v1337_v15 = vpop.f32.mrf.mxu1 }
 0x1c7   : > { %v739_v17 = vadd.f32 %v1337_v15, %v1568_v47 }
 0x1c8   : > { %v730_v18 = vpop.f32.mrf.mxu1 }
 0x1c9   : > { %v1165_v20 = vpack.c.bf16 %v739_v17, %v736_v16  ;;  %v731_v21 = vadd.f32 %v1568_v47, %v730_v18 }
 0x1ca   : > { %v1340_v22 = vpop.f32.mrf.mxu1 }
 0x1cb   : > { %1213 = vst [vmem:[%s1576_s8 + $0x38] sm:$0xff] %v1165_v20   ;;  %v1160_v23 = vpack.c.bf16 %v731_v21, %v728_v19  ;;  %v752_v26 = vadd.f32 %v1340_v22, %v1568_v47 }
 0x1cc   : > { %v743_v24 = vpop.f32.mrf.mxu1 }
 0x1cd   : > { %1212 = vst [vmem:[%s1576_s8 + $0x30] sm:$0xff] %v1160_v23   ;;  %v744_v29 = vadd.f32 %v1568_v47, %v743_v24 }
 0x1ce   : > { %v1341_v25 = vpop.f32.mrf.mxu1 }
 0x1cf   : > { %v755_v27 = vadd.f32 %v1341_v25, %v1568_v47 }
 0x1d0   : > { %v746_v28 = vpop.f32.mrf.mxu1 }
 0x1d1   : > { %v1175_v30 = vpack.c.bf16 %v755_v27, %v752_v26  ;;  %v747_v31 = vadd.f32 %v1568_v47, %v746_v28 }
 0x1d2   : > { %v1344_v32 = vpop.f32.mrf.mxu1 }
 0x1d3   : > { %1215 = vst [vmem:[%s1576_s8 + $0x48] sm:$0xff] %v1175_v30   ;;  %v1170_v33 = vpack.c.bf16 %v747_v31, %v744_v29  ;;  %v768_v36 = vadd.f32 %v1344_v32, %v1568_v47 }
 0x1d4   : > { %v759_v34 = vpop.f32.mrf.mxu1 }
 0x1d5   : > { %1214 = vst [vmem:[%s1576_s8 + $0x40] sm:$0xff] %v1170_v33   ;;  %v760_v39 = vadd.f32 %v1568_v47, %v759_v34 }
 0x1d6   : > { %v1345_v35 = vpop.f32.mrf.mxu1 }
 0x1d7   : > { %v771_v37 = vadd.f32 %v1345_v35, %v1568_v47 }
 0x1d8   : > { %v762_v38 = vpop.f32.mrf.mxu1 }
 0x1d9   : > { %v1185_v40 = vpack.c.bf16 %v771_v37, %v768_v36  ;;  %v763_v41 = vadd.f32 %v1568_v47, %v762_v38 }
 0x1da   : > { %v1348_v42 = vpop.f32.mrf.mxu1 }
 0x1db   : > { %1217 = vst [vmem:[%s1576_s8 + $0x58] sm:$0xff] %v1185_v40   ;;  %v1180_v43 = vpack.c.bf16 %v763_v41, %v760_v39  ;;  %v784_v46 = vadd.f32 %v1348_v42, %v1568_v47 }
 0x1dc   : > { %v775_v44 = vpop.f32.mrf.mxu1 }
 0x1dd   : > { %1216 = vst [vmem:[%s1576_s8 + $0x50] sm:$0xff] %v1180_v43   ;;  %v776_v50 = vadd.f32 %v1568_v47, %v775_v44 }
 0x1de   : > { %v1349_v45 = vpop.f32.mrf.mxu1 }
 0x1df   : > { %v787_v48 = vadd.f32 %v1349_v45, %v1568_v47 }
 0x1e0   : > { %v778_v49 = vpop.f32.mrf.mxu1 }
 0x1e1   : > { %v1195_v62 = vpack.c.bf16 %v787_v48, %v784_v46  ;;  %v779_v51 = vadd.f32 %v1568_v47, %v778_v49 }
 0x1e2   : > { %v1352_v52 = vpop.f32.mrf.mxu1 }
 0x1e3   : > { %1219 = vst [vmem:[%s1576_s8 + $0x68] sm:$0xff] %v1195_v62   ;;  %v1190_v53 = vpack.c.bf16 %v779_v51, %v776_v50  ;;  %v800_v56 = vadd.f32 %v1352_v52, %v1568_v47 }
 0x1e4   : > { %v791_v54 = vpop.f32.mrf.mxu1 }
 0x1e5   : > { %1218 = vst [vmem:[%s1576_s8 + $0x60] sm:$0xff] %v1190_v53   ;;  %v792_v59 = vadd.f32 %v1568_v47, %v791_v54 }
 0x1e6   : > { %v1353_v55 = vpop.f32.mrf.mxu1 }
 0x1e7   : > { %v803_v57 = vadd.f32 %v1353_v55, %v1568_v47 }
 0x1e8   : > { %v794_v58 = vpop.f32.mrf.mxu1 }
 0x1e9   : > { %v1205_v60 = vpack.c.bf16 %v803_v57, %v800_v56  ;;  %v795_v61 = vadd.f32 %v1568_v47, %v794_v58 }
 0x1eb   : > { %1221 = vst [vmem:[%s1576_s8 + $0x78] sm:$0xff] %v1205_v60   ;;  %v1200_v63 = vpack.c.bf16 %v795_v61, %v792_v59 }
 0x1ed   : > { %1220 = vst [vmem:[%s1576_s8 + $0x70] sm:$0xff] %v1200_v63  }
 0x1ee PF: > { %s15_s18 = sadd.s32 1, %s1396_s18  }
 0x1ef   : > { %p12_p4 = scmp.ge.s32.totalorder %s15_s18, 4  }
 0x1f1   :  { %14 = sbr.rel (!%p12_p4) target bundleno = 1 (0x1), region = 70 }

</bundles_post_ra>
